<compile_context>
chip_gen: v5e
topology: v5e:2x2
jax: 0.10.0
libtpu: 0.0.40
codegen_flags: <defaults>
</compile_context>

<pallas_src>
import jax
import jax.numpy as jnp
from jax.experimental import pallas as pl
from jax.experimental.pallas import tpu as pltpu


def _round_up(x, m):
    return ((x + m - 1) // m) * m


def mlp_module_kernel(sample_ref, query_ref,
                      w1_ref, b1_ref, w2_ref, b2_ref, w3_ref, b3_ref,
                      o_ref):
    # One grid step == TB batch rows.
    w_dt = w1_ref.dtype
    s = sample_ref[...]                                                # (TB, D) cd

    # fc1 -> relu   (f32 accumulation on the MXU)
    h1 = jnp.dot(s, w1_ref[...], preferred_element_type=jnp.float32) + b1_ref[...]
    h1 = jnp.maximum(h1, 0.0)                                          # (TB, H) f32
    # dropout1: eval-mode identity

    # fc2 -> relu
    h2 = jnp.dot(h1.astype(w_dt), w2_ref[...],
                 preferred_element_type=jnp.float32) + b2_ref[...]
    h2 = jnp.maximum(h2, 0.0)                                          # (TB, H) f32
    # dropout2: eval-mode identity

    # out -> tanh : per-sample "weight vector"
    wv = jnp.tanh(
        jnp.dot(h2.astype(w_dt), w3_ref[...],
                preferred_element_type=jnp.float32) + b3_ref[...]
    )                                                                  # (TB, D) f32

    # sigmoid( sum_d query[b,q,d] * wv[b,d] )
    # VPU multiply in the compute dtype (no f32 copy of the query tile),
    # lane reduction accumulated in f32.
    q = query_ref[...]                                                 # (TB, Q, D) cd
    prod = q * wv.astype(q.dtype)[:, None, :]                          # (TB, Q, D) cd
    logits = jnp.sum(prod, axis=-1, dtype=jnp.float32)                 # (TB, Q) f32
    o_ref[...] = jax.nn.sigmoid(logits)                                # dense store


def init_params(key, input_dim, hidden_dim):
    """PyTorch-Linear-style uniform init; weights kept (in, out)."""
    ks = jax.random.split(key, 6)

    def linear(kw, kb, fan_in, fan_out):
        bound = 1.0 / jnp.sqrt(fan_in)
        w = jax.random.uniform(kw, (fan_in, fan_out), jnp.float32, -bound, bound)
        b = jax.random.uniform(kb, (1, fan_out), jnp.float32, -bound, bound)
        return w, b

    w1, b1 = linear(ks[0], ks[1], input_dim, hidden_dim)
    w2, b2 = linear(ks[2], ks[3], hidden_dim, hidden_dim)
    w3, b3 = linear(ks[4], ks[5], hidden_dim, input_dim)
    return (w1, b1, w2, b2, w3, b3)


def prepare_params(params, *, compute_dtype=jnp.float32,
                   hidden_multiple=128, input_multiple=128):
    """Model-load-time preparation (do this ONCE, not per forward call).

    * Zero-pads the hidden dim (and, if needed, the input dim) to lane-aligned
      multiples. Exact semantics: padded hidden units / input lanes have zero
      weights and zero biases, so relu(0)=0 and they contribute nothing.
    * Casts weights to the compute dtype (bf16 recommended on all generations:
      full-rate MXU on v5e/v6e/v7x, half the weight/query DMA bytes).  Biases
      stay f32 (they add into f32 accumulators).
    * On v6e/v7x with large H, pass hidden_multiple=256 to fill the 256x256
      MXU tile; keep 128 on v5e or when H is tiny.
    """
    w1, b1, w2, b2, w3, b3 = params
    D, H = w1.shape
    Hp = _round_up(H, hidden_multiple)
    Dp = _round_up(D, input_multiple)
    dh, dd = Hp - H, Dp - D
    w1 = jnp.pad(w1, ((0, dd), (0, dh)))
    b1 = jnp.pad(b1, ((0, 0), (0, dh)))
    w2 = jnp.pad(w2, ((0, dh), (0, dh)))
    b2 = jnp.pad(b2, ((0, 0), (0, dh)))
    w3 = jnp.pad(w3, ((0, dh), (0, dd)))
    b3 = jnp.pad(b3, ((0, 0), (0, dd)))
    cd = compute_dtype
    return (w1.astype(cd), b1.astype(jnp.float32),
            w2.astype(cd), b2.astype(jnp.float32),
            w3.astype(cd), b3.astype(jnp.float32))


def mlp_module_forward(sample, query, params, *, tb=None):
    """sample: (B, D) f32, query: (B, Q, D) f32 -> (B, Q, 1) f32.

    `params` must come from prepare_params (padded, pre-transposed (in, out),
    pre-cast to the compute dtype). Compute dtype is inferred from w1.dtype.
    """
    w1, b1, w2, b2, w3, b3 = params
    cd = w1.dtype
    Dp, Hp = w1.shape
    # Guard the padding contract (review correctness concern).
    assert Hp % 128 == 0 and Dp % 128 == 0, "params must come from prepare_params"

    B, D = sample.shape
    Bq, Q, Dq = query.shape
    assert Bq == B and Dq == D

    # Pad the input dim of the activations to match the padded weights
    # (no-op when D is already 128-aligned; padded lanes hit zero W1 rows).
    if D != Dp:
        sample = jnp.pad(sample, ((0, 0), (0, Dp - D)))
        query = jnp.pad(query, ((0, 0), (0, 0), (0, Dp - D)))

    sample_c = sample.astype(cd)
    query_c = query.astype(cd)

    if tb is None:
        if B <= 8:
            tb = B
        else:
            # Aim for >= 2 grid steps so the "parallel" axis can shard across
            # both TensorCores on v7x; 8-row alignment keeps sublanes full.
            tb = min(256, _round_up(pl.cdiv(B, 2), 8), _round_up(B, 8))
    n_tiles = pl.cdiv(B, tb)
    # NOTE: when B % tb != 0 the last grid step computes tanh/sigmoid on
    # whatever Pallas fetched for the out-of-range rows; the output write is
    # clipped to B rows, so the visible result is still exact.

    itemsize = jnp.dtype(cd).itemsize
    weight_bytes = (Dp * Hp + Hp * Hp + Hp * Dp) * itemsize + (2 * Hp + Dp) * 4
    io_bytes = 2 * (tb * Dp + tb * Q * Dp) * itemsize + 2 * tb * Q * 4
    act_bytes = 4 * tb * max(Hp, Dp) * 4 + tb * Q * Dp * itemsize
    vmem_limit = int(min(max(2 * (weight_bytes + io_bytes + act_bytes), 32 << 20),
                         64 << 20))

    cost = pl.CostEstimate(
        flops=2 * B * (Dp * Hp + Hp * Hp + Hp * Dp) + 2 * B * Q * Dp,
        transcendentals=B * Dp + B * Q,                     # tanh + sigmoid
        bytes_accessed=(B * Dp + B * Q * Dp) * itemsize + weight_bytes + B * Q * 4,
    )

    # Constant index_maps -> the weights/biases never re-DMA; single-buffer
    # them so they only occupy one VMEM copy.
    resident = dict(pipeline_mode=pl.Buffered(1))

    out2d = pl.pallas_call(
        mlp_module_kernel,
        out_shape=jax.ShapeDtypeStruct((B, Q), jnp.float32),
        grid=(n_tiles,),
        in_specs=[
            pl.BlockSpec((tb, Dp), lambda i: (i, 0)),         # sample tile
            pl.BlockSpec((tb, Q, Dp), lambda i: (i, 0, 0)),   # query tile
            pl.BlockSpec((Dp, Hp), lambda i: (0, 0), **resident),   # W1
            pl.BlockSpec((1, Hp), lambda i: (0, 0), **resident),    # b1
            pl.BlockSpec((Hp, Hp), lambda i: (0, 0), **resident),   # W2
            pl.BlockSpec((1, Hp), lambda i: (0, 0), **resident),    # b2
            pl.BlockSpec((Hp, Dp), lambda i: (0, 0), **resident),   # W3
            pl.BlockSpec((1, Dp), lambda i: (0, 0), **resident),    # b3
        ],
        out_specs=pl.BlockSpec((tb, Q), lambda i: (i, 0)),
        compiler_params=pltpu.CompilerParams(
            dimension_semantics=("parallel",),
            vmem_limit_bytes=vmem_limit),
        cost_estimate=cost,
    )(sample_c, query_c, w1, b1, w2, b2, w3, b3)

    # Restore the PyTorch module's trailing singleton dim outside the kernel.
    return out2d[..., None]


def reference_forward(sample, query, params):
    """Pure-JAX reference mirroring the PyTorch module (eval mode)."""
    w1, b1, w2, b2, w3, b3 = params
    h = jnp.maximum(sample @ w1 + b1, 0.0)
    h = jnp.maximum(h @ w2 + b2, 0.0)
    wv = jnp.tanh(h @ w3 + b3)                     # (B, D)
    logits = jnp.einsum("bqd,bd->bq", query, wv)[..., None]
    return jax.nn.sigmoid(logits)


if __name__ == "__main__":
    B, Q, D, H = 2, 8, 128, 64   # batch, query size, input_dim, hidden_dim

    key = jax.random.PRNGKey(0)
    k_param, k_sample, k_query = jax.random.split(key, 3)

    raw_params = init_params(k_param, input_dim=D, hidden_dim=H)
    sample = jax.random.normal(k_sample, (B, D), jnp.float32)
    query = jax.random.normal(k_query, (B, Q, D), jnp.float32)

    ref = reference_forward(sample, query, raw_params)

    # f32 path: strict numerical match against the PyTorch-equivalent reference.
    params_f32 = prepare_params(raw_params, compute_dtype=jnp.float32)
    out = jax.block_until_ready(mlp_module_forward(sample, query, params_f32))
    assert out.shape == (B, Q, 1)
    assert jnp.allclose(out, ref, atol=1e-5, rtol=1e-5)

    # bf16 weights/sample/query path (perf mode on v5e/v6e/v7x), f32 accumulation.
    params_bf16 = prepare_params(raw_params, compute_dtype=jnp.bfloat16)
    out_bf16 = jax.block_until_ready(mlp_module_forward(sample, query, params_bf16))
    assert out_bf16.shape == (B, Q, 1)
    assert jnp.allclose(out_bf16, ref, atol=5e-2)

    print("KERNEL_OK")
</pallas_src>

<mosaic_0001>
module attributes {stable_mosaic.version = 11 : i64} {
  func.func @mlp_module_kernel(%arg0: i32, %arg1: memref<2x128xf32, #tpu.memory_space<vmem>>, %arg2: memref<2x8x128xf32, #tpu.memory_space<vmem>>, %arg3: memref<128x128xf32, #tpu.memory_space<vmem>>, %arg4: memref<1x128xf32, #tpu.memory_space<vmem>>, %arg5: memref<128x128xf32, #tpu.memory_space<vmem>>, %arg6: memref<1x128xf32, #tpu.memory_space<vmem>>, %arg7: memref<128x128xf32, #tpu.memory_space<vmem>>, %arg8: memref<1x128xf32, #tpu.memory_space<vmem>>, %arg9: memref<2x8xf32, #tpu.memory_space<vmem>>) attributes {dimension_semantics = [#tpu.dimension_semantics<parallel>], iteration_bounds = array<i64: 1>, scalar_prefetch = 0 : i64, scratch_operands = 0 : i64, tpu.core_type = #tpu.core_type<tc>, window_params = [{transform_indices = @transform_0, window_bounds = array<i64: 2, 128>}, {transform_indices = @transform_1, window_bounds = array<i64: 2, 8, 128>}, {pipeline_mode = #tpu.pipeline_mode<synchronous>, transform_indices = @transform_2, window_bounds = array<i64: 128, 128>}, {pipeline_mode = #tpu.pipeline_mode<synchronous>, transform_indices = @transform_3, window_bounds = array<i64: 1, 128>}, {pipeline_mode = #tpu.pipeline_mode<synchronous>, transform_indices = @transform_4, window_bounds = array<i64: 128, 128>}, {pipeline_mode = #tpu.pipeline_mode<synchronous>, transform_indices = @transform_5, window_bounds = array<i64: 1, 128>}, {pipeline_mode = #tpu.pipeline_mode<synchronous>, transform_indices = @transform_6, window_bounds = array<i64: 128, 128>}, {pipeline_mode = #tpu.pipeline_mode<synchronous>, transform_indices = @transform_7, window_bounds = array<i64: 1, 128>}, {transform_indices = @transform_8, window_bounds = array<i64: 2, 8>}]} {
    %c0 = arith.constant 0 : index
    %c0_0 = arith.constant 0 : index
    %0 = vector.load %arg1[%c0, %c0_0] : memref<2x128xf32, #tpu.memory_space<vmem>>, vector<2x128xf32>
    %c0_1 = arith.constant 0 : index
    %c0_2 = arith.constant 0 : index
    %1 = vector.load %arg3[%c0_1, %c0_2] : memref<128x128xf32, #tpu.memory_space<vmem>>, vector<128x128xf32>
    %cst = arith.constant dense<0.000000e+00> : vector<2x128xf32>
    %2 = tpu.matmul %0, %1, %cst {dimension_numbers = #tpu.dot_dimension_numbers<[1], [0], [0], [1], [0, 0, 1, 1], [], []>} : vector<2x128xf32>, vector<128x128xf32>, vector<2x128xf32> -> vector<2x128xf32>
    %c0_3 = arith.constant 0 : index
    %c0_4 = arith.constant 0 : index
    %3 = vector.load %arg4[%c0_3, %c0_4] : memref<1x128xf32, #tpu.memory_space<vmem>>, vector<1x128xf32>
    %4 = vector.broadcast %3 : vector<1x128xf32> to vector<2x128xf32>
    %5 = arith.addf %2, %4 : vector<2x128xf32>
    %cst_5 = arith.constant 0.000000e+00 : f32
    %6 = vector.broadcast %cst_5 : f32 to vector<2x128xf32>
    %7 = arith.maximumf %5, %6 : vector<2x128xf32>
    %c0_6 = arith.constant 0 : index
    %c0_7 = arith.constant 0 : index
    %8 = vector.load %arg5[%c0_6, %c0_7] : memref<128x128xf32, #tpu.memory_space<vmem>>, vector<128x128xf32>
    %cst_8 = arith.constant dense<0.000000e+00> : vector<2x128xf32>
    %9 = tpu.matmul %7, %8, %cst_8 {dimension_numbers = #tpu.dot_dimension_numbers<[1], [0], [0], [1], [0, 0, 1, 1], [], []>} : vector<2x128xf32>, vector<128x128xf32>, vector<2x128xf32> -> vector<2x128xf32>
    %c0_9 = arith.constant 0 : index
    %c0_10 = arith.constant 0 : index
    %10 = vector.load %arg6[%c0_9, %c0_10] : memref<1x128xf32, #tpu.memory_space<vmem>>, vector<1x128xf32>
    %11 = vector.broadcast %10 : vector<1x128xf32> to vector<2x128xf32>
    %12 = arith.addf %9, %11 : vector<2x128xf32>
    %cst_11 = arith.constant 0.000000e+00 : f32
    %13 = vector.broadcast %cst_11 : f32 to vector<2x128xf32>
    %14 = arith.maximumf %12, %13 : vector<2x128xf32>
    %c0_12 = arith.constant 0 : index
    %c0_13 = arith.constant 0 : index
    %15 = vector.load %arg7[%c0_12, %c0_13] : memref<128x128xf32, #tpu.memory_space<vmem>>, vector<128x128xf32>
    %cst_14 = arith.constant dense<0.000000e+00> : vector<2x128xf32>
    %16 = tpu.matmul %14, %15, %cst_14 {dimension_numbers = #tpu.dot_dimension_numbers<[1], [0], [0], [1], [0, 0, 1, 1], [], []>} : vector<2x128xf32>, vector<128x128xf32>, vector<2x128xf32> -> vector<2x128xf32>
    %c0_15 = arith.constant 0 : index
    %c0_16 = arith.constant 0 : index
    %17 = vector.load %arg8[%c0_15, %c0_16] : memref<1x128xf32, #tpu.memory_space<vmem>>, vector<1x128xf32>
    %18 = vector.broadcast %17 : vector<1x128xf32> to vector<2x128xf32>
    %19 = arith.addf %16, %18 : vector<2x128xf32>
    %20 = math.tanh %19 : vector<2x128xf32>
    %c0_17 = arith.constant 0 : index
    %c0_18 = arith.constant 0 : index
    %c0_19 = arith.constant 0 : index
    %21 = vector.load %arg2[%c0_17, %c0_18, %c0_19] : memref<2x8x128xf32, #tpu.memory_space<vmem>>, vector<2x8x128xf32>
    %22 = vector.shape_cast %20 : vector<2x128xf32> to vector<2x1x128xf32>
    %23 = vector.broadcast %22 : vector<2x1x128xf32> to vector<2x8x128xf32>
    %24 = arith.mulf %21, %23 : vector<2x8x128xf32>
    %cst_20 = arith.constant dense<0.000000e+00> : vector<2x8xf32>
    %25 = vector.multi_reduction <add>, %24, %cst_20 [2] : vector<2x8x128xf32> to vector<2x8xf32>
    %26 = arith.negf %25 : vector<2x8xf32>
    %27 = math.exp %26 : vector<2x8xf32>
    %cst_21 = arith.constant 1.000000e+00 : f32
    %28 = vector.broadcast %cst_21 : f32 to vector<2x8xf32>
    %29 = arith.addf %28, %27 : vector<2x8xf32>
    %30 = arith.divf %28, %29 : vector<2x8xf32>
    %c0_22 = arith.constant 0 : index
    %c0_23 = arith.constant 0 : index
    %31 = vector.load %arg9[%c0_22, %c0_23] : memref<2x8xf32, #tpu.memory_space<vmem>>, vector<2x8xf32>
    tpu.vector_store %arg9[%c0_22, %c0_23], %30 {strides = array<i32>} : memref<2x8xf32, #tpu.memory_space<vmem>>, vector<2x8xf32>,
    return
  }
  func.func @transform_0(%arg0: i32) -> (i32, i32) {
    %c0_i32 = arith.constant 0 : i32
    %c0_i32_0 = arith.constant 0 : i32
    return %arg0, %c0_i32 : i32, i32
  }
  func.func @transform_1(%arg0: i32) -> (i32, i32, i32) {
    %c0_i32 = arith.constant 0 : i32
    %c0_i32_0 = arith.constant 0 : i32
    %c0_i32_1 = arith.constant 0 : i32
    return %arg0, %c0_i32, %c0_i32_0 : i32, i32, i32
  }
  func.func @transform_2(%arg0: i32) -> (i32, i32) {
    %c0_i32 = arith.constant 0 : i32
    %c0_i32_0 = arith.constant 0 : i32
    %c0_i32_1 = arith.constant 0 : i32
    return %c0_i32, %c0_i32_0 : i32, i32
  }
  func.func @transform_3(%arg0: i32) -> (i32, i32) {
    %c0_i32 = arith.constant 0 : i32
    %c0_i32_0 = arith.constant 0 : i32
    %c0_i32_1 = arith.constant 0 : i32
    return %c0_i32, %c0_i32_0 : i32, i32
  }
  func.func @transform_4(%arg0: i32) -> (i32, i32) {
    %c0_i32 = arith.constant 0 : i32
    %c0_i32_0 = arith.constant 0 : i32
    %c0_i32_1 = arith.constant 0 : i32
    return %c0_i32, %c0_i32_0 : i32, i32
  }
  func.func @transform_5(%arg0: i32) -> (i32, i32) {
    %c0_i32 = arith.constant 0 : i32
    %c0_i32_0 = arith.constant 0 : i32
    %c0_i32_1 = arith.constant 0 : i32
    return %c0_i32, %c0_i32_0 : i32, i32
  }
  func.func @transform_6(%arg0: i32) -> (i32, i32) {
    %c0_i32 = arith.constant 0 : i32
    %c0_i32_0 = arith.constant 0 : i32
    %c0_i32_1 = arith.constant 0 : i32
    return %c0_i32, %c0_i32_0 : i32, i32
  }
  func.func @transform_7(%arg0: i32) -> (i32, i32) {
    %c0_i32 = arith.constant 0 : i32
    %c0_i32_0 = arith.constant 0 : i32
    %c0_i32_1 = arith.constant 0 : i32
    return %c0_i32, %c0_i32_0 : i32, i32
  }
  func.func @transform_8(%arg0: i32) -> (i32, i32) {
    %c0_i32 = arith.constant 0 : i32
    %c0_i32_0 = arith.constant 0 : i32
    return %arg0, %c0_i32 : i32, i32
  }
}

</mosaic_0001>

<bundles_post_ra>
// kernel: tpu_custom_call.1
= control target key start
LH: loop header
LB: loop body
LE: loop exit
PB: predicated region body
PF: predicated region fallthrough
CT: control target
= control target key end

     0   :  { %13 = vsyncpa [#allocation3], 0  ;;  %s567_s0 = inlined_call_operand.hbm [shape: f32[2,128], index: 0, kind: input, shape index: {}]   ;;  %s568_s1 = inlined_call_operand.hbm [shape: f32[2,8,128], index: 1, kind: input, shape index: {}]   ;;  %s569_s2 = inlined_call_operand.hbm [shape: f32[128,128], index: 2, kind: input, shape index: {}]   ;;  %s570_s3 = inlined_call_operand.vmem [shape: f32[1,128], index: 3, kind: input, shape index: {}]   ;;  %s571_s4 = inlined_call_operand.hbm [shape: f32[128,128], index: 4, kind: input, shape index: {}]   ;;  %s572_s5 = inlined_call_operand.vmem [shape: f32[1,128], index: 5, kind: input, shape index: {}]   ;;  %s573_s6 = inlined_call_operand.hbm [shape: f32[128,128], index: 6, kind: input, shape index: {}]   ;;  %s574_s7 = inlined_call_operand.vmem [shape: f32[1,128], index: 7, kind: input, shape index: {}]   ;;  %s575_s8 = inlined_call_operand.hbm [shape: f32[2,8], index: 8, kind: output, shape index: {}]  }
   0x1   :  { %14 = vsyncpa [#allocation6], 0 }
   0x2   :  { %15 = vsyncpa [#allocation9], 0  ;;  %s32_s29 = sshll.u32 %s568_s1, 4  ;;  %s33_s29 = int_to_ptr.hbm [resolvable:$true] %s32_s29 }
   0x3   :  { %16 = vsyncpa [#allocation4], 0  ;;  %s487_s30 = smov [#allocation5]   ;;  %s60_s12 = sshll.u32 %s571_s4, 4  ;;  %s61_s12 = int_to_ptr.hbm [resolvable:$true] %s60_s12 }
   0x4   :  { %s34_s9 = sshll.u32 %s487_s30, 4  ;;  %s488_s13 = smov 128   ;;  %s35_s9 = int_to_ptr.vmem [resolvable:$true] %s34_s9 }
   0x5   :  { %s489_s14 = smov 8   ;;  %s490_s15 = smov [#allocation8]  }
   0x6   :  { %40 = dma.hbm_to_vmem [thread:$0]  %s33_s29, 256, %s35_s9, [#allocation6], %s488_s13, %s488_s13, %s489_s14  }
   0x7   :  { %s62_s16 = sshll.u32 %s490_s15, 4  ;;  %s22_s19 = sshll.u32 %s567_s0, 4  ;;  %s63_s16 = int_to_ptr.vmem [resolvable:$true] %s62_s16  ;;  %s23_s19 = int_to_ptr.hbm [resolvable:$true] %s22_s19 }
   0x8   :  { %68 = dma.hbm_to_vmem [thread:$0]  %s61_s12, 2048, %s63_s16, [#allocation9], %s488_s13, %s488_s13, %s489_s14  }
   0x9   :  { %s45_s21 = sshll.u32 %s569_s2, 4  ;;  %s491_s22 = smov [#allocation2]   ;;  %s46_s21 = int_to_ptr.hbm [resolvable:$true] %s45_s21 }
   0xa   :  { %s24_s23 = sshll.u32 %s491_s22, 4  ;;  %s492_s4 = smov [#allocation7]   ;;  %s25_s23 = int_to_ptr.vmem [resolvable:$true] %s24_s23 }
   0xb   :  { %27 = dma.hbm_to_vmem [thread:$0]  %s23_s19, 32, %s25_s23, [#allocation3]  }
   0xc   :  { %s47_s24 = sshll.u32 %s492_s4, 4  ;;  %s75_s27 = sshll.u32 %s573_s6, 4  ;;  %s48_s24 = int_to_ptr.vmem [resolvable:$true] %s47_s24  ;;  %s76_s27 = int_to_ptr.hbm [resolvable:$true] %s75_s27 }
   0xd   :  { %53 = dma.hbm_to_vmem [thread:$0]  %s46_s21, 2048, %s48_s24, [#allocation6], %s488_s13, %s488_s13, %s489_s14  }
   0xe   :  { %s493_s0 = smov [#allocation10]  }
   0xf   :  { %s77_s28 = sshll.u32 %s493_s0, 4  ;;  %s78_s28 = int_to_ptr.vmem [resolvable:$true] %s77_s28 }
  0x10   :  { %83 = dma.hbm_to_vmem [thread:$0]  %s76_s27, 2048, %s78_s28, [#allocation9], %s488_s13, %s488_s13, %s489_s14  }
  0x11   :  { %479 = dma.done.wait [#allocation3], 32  }
  0x12   :  { %480 = vsyncadd [#allocation3], 4294967264 }
  0x13   :  { %481 = dma.done.wait [#allocation6], 2304  }
  0x14   :  { %482 = vsyncadd [#allocation6], 4294964992 }
  0x15   :  { %483 = dma.done.wait [#allocation9], 4096  }
  0x16   :  { %484 = vsyncadd [#allocation9], 4294963200  ;;  %v122_v0 = vld [vmem:[#allocation7 + $0x78] sm:$0xff]  ;;  %v121_v1 = vld [vmem:[#allocation7 + $0x70] sm:$0xff]  ;;  %s300_s12 = sshll.u32 %s575_s8, 4  ;;  %vm288_vm8 = vcmask 1041409   ;;  %s301_s12 = int_to_ptr.hbm [resolvable:$true] %s300_s12 }
  0x17   :  { %127 = vmatpush.msra.mxu0 %v122_v0  ;;  %v120_v2 = vld [vmem:[#allocation7 + $0x68] sm:$0xff]  ;;  %v119_v3 = vld [vmem:[#allocation7 + $0x60] sm:$0xff]  ;;  %v163_v4 = vld [vmem:[#allocation8 + $0x78] sm:$0xff]  ;;  %vm291_vm9 = vcmask 58368  }
  0x18   :  { %v118_v5 = vld [vmem:[#allocation7 + $0x58] sm:$0xff]  ;;  %168 = vmatpush.msra.mxu1 %v163_v4  ;;  %v162_v6 = vld [vmem:[#allocation8 + $0x70] sm:$0xff]  ;;  %v161_v7 = vld [vmem:[#allocation8 + $0x68] sm:$0xff] }
  0x19   :  { %128 = vmatpush.msra.mxu0 %v121_v1  ;;  %v117_v8 = vld [vmem:[#allocation7 + $0x50] sm:$0xff]  ;;  %v160_v9 = vld [vmem:[#allocation8 + $0x60] sm:$0xff]  ;;  %v116_v10 = vld [vmem:[#allocation7 + $0x48] sm:$0xff] }
  0x1a   :  { %169 = vmatpush.msra.mxu1 %v162_v6  ;;  %v159_v11 = vld [vmem:[#allocation8 + $0x58] sm:$0xff]  ;;  %v115_v12 = vld [vmem:[#allocation7 + $0x40] sm:$0xff]  ;;  %v158_v13 = vld [vmem:[#allocation8 + $0x50] sm:$0xff] }
  0x1b   :  { %129 = vmatpush.msra.mxu0 %v120_v2  ;;  %v114_v14 = vld [vmem:[#allocation7 + $0x38] sm:$0xff]  ;;  %v157_v15 = vld [vmem:[#allocation8 + $0x48] sm:$0xff]  ;;  %v113_v16 = vld [vmem:[#allocation7 + $0x30] sm:$0xff] }
  0x1c   :  { %170 = vmatpush.msra.mxu1 %v161_v7  ;;  %v156_v17 = vld [vmem:[#allocation8 + $0x40] sm:$0xff]  ;;  %v112_v18 = vld [vmem:[#allocation7 + $0x28] sm:$0xff]  ;;  %v155_v19 = vld [vmem:[#allocation8 + $0x38] sm:$0xff] }
  0x1d   :  { %130 = vmatpush.msra.mxu0 %v119_v3  ;;  %v111_v20 = vld [vmem:[#allocation7 + $0x20] sm:$0xff]  ;;  %v154_v21 = vld [vmem:[#allocation8 + $0x30] sm:$0xff]  ;;  %v110_v22 = vld [vmem:[#allocation7 + $0x18] sm:$0xff] }
  0x1e   :  { %171 = vmatpush.msra.mxu1 %v160_v9  ;;  %v153_v23 = vld [vmem:[#allocation8 + $0x28] sm:$0xff]  ;;  %v109_v24 = vld [vmem:[#allocation7 + $0x10] sm:$0xff]  ;;  %v152_v25 = vld [vmem:[#allocation8 + $0x20] sm:$0xff] }
  0x1f   :  { %131 = vmatpush.msra.mxu0 %v118_v5  ;;  %v108_v26 = vld [vmem:[#allocation7 + $0x8] sm:$0xff]  ;;  %v151_v27 = vld [vmem:[#allocation8 + $0x18] sm:$0xff]  ;;  %v107_v28 = vld [vmem:[#allocation7] sm:$0xff] }
  0x20   :  { %172 = vmatpush.msra.mxu1 %v159_v11  ;;  %v106_v29 = vld [vmem:[#allocation2] sm:$0x3]  ;;  %v150_v30 = vld [vmem:[#allocation8 + $0x10] sm:$0xff]  ;;  %v148_v32 = vld [vmem:[#allocation8] sm:$0xff] }
  0x21   :  { %132 = vmatpush.msra.mxu0 %v117_v8  ;;  %v149_v31 = vld [vmem:[#allocation8 + $0x8] sm:$0xff]  ;;  %v204_v33 = vld [vmem:[#allocation10 + $0x78] sm:$0xff]  ;;  %v203_v34 = vld [vmem:[#allocation10 + $0x70] sm:$0xff] }
  0x22   :  { %173 = vmatpush.msra.mxu1 %v158_v13  ;;  %209 = vmatpush.msra.mxu2 %v204_v33  ;;  %v202_v35 = vld [vmem:[#allocation10 + $0x68] sm:$0xff]  ;;  %v201_v36 = vld [vmem:[#allocation10 + $0x60] sm:$0xff]  ;;  %v200_v37 = vld [vmem:[#allocation10 + $0x58] sm:$0xff] }
  0x23   :  { %133 = vmatpush.msra.mxu0 %v116_v10  ;;  %v199_v38 = vld [vmem:[#allocation10 + $0x50] sm:$0xff]  ;;  %v198_v39 = vld [vmem:[#allocation10 + $0x48] sm:$0xff]  ;;  %v197_v40 = vld [vmem:[#allocation10 + $0x40] sm:$0xff] }
  0x24   :  { %174 = vmatpush.msra.mxu1 %v157_v15  ;;  %210 = vmatpush.msra.mxu2 %v203_v34  ;;  %v196_v41 = vld [vmem:[#allocation10 + $0x38] sm:$0xff]  ;;  %v195_v42 = vld [vmem:[#allocation10 + $0x30] sm:$0xff]  ;;  %v194_v43 = vld [vmem:[#allocation10 + $0x28] sm:$0xff] }
  0x25   :  { %134 = vmatpush.msra.mxu0 %v115_v12  ;;  %v193_v44 = vld [vmem:[#allocation10 + $0x20] sm:$0xff]  ;;  %v192_v45 = vld [vmem:[#allocation10 + $0x18] sm:$0xff]  ;;  %v322_v46 = vld [vmem:[%s570_s3] ss:$0 sm:$0xff] }
  0x26   :  { %175 = vmatpush.msra.mxu1 %v156_v17  ;;  %211 = vmatpush.msra.mxu2 %v202_v35  ;;  %v191_v50 = vld [vmem:[#allocation10 + $0x10] sm:$0xff]  ;;  %v190_v51 = vld [vmem:[#allocation10 + $0x8] sm:$0xff]  ;;  %v189_v52 = vld [vmem:[#allocation10] sm:$0xff] }
  0x27   :  { %135 = vmatpush.msra.mxu0 %v114_v14  ;;  %v323_v53 = vld [vmem:[%s572_s5] ss:$0 sm:$0xff]  ;;  %v230_v61 = vld [vmem:[#allocation5] sm:$0xff]  ;;  %v231_v2 = vld [vmem:[#allocation5 + $0x8] sm:$0xff]  ;;  %s494_s5 = smov [#allocation11]  }
  0x28   :  { %176 = vmatpush.msra.mxu1 %v155_v19  ;;  %212 = vmatpush.msra.mxu2 %v201_v36  ;;  %v324_v57 = vld [vmem:[%s574_s7] ss:$0 sm:$0xff]  ;;  %s298_s7 = sshll.u32 %s494_s5, 4  ;;  %s299_s7 = int_to_ptr.vmem [resolvable:$true] %s298_s7 }
  0x29   :  { %136 = vmatpush.msra.mxu0 %v113_v16 }
  0x2a   :  { %177 = vmatpush.msra.mxu1 %v154_v21  ;;  %213 = vmatpush.msra.mxu2 %v200_v37 }
  0x2b   :  { %137 = vmatpush.msra.mxu0 %v112_v18 }
  0x2c   :  { %178 = vmatpush.msra.mxu1 %v153_v23  ;;  %214 = vmatpush.msra.mxu2 %v199_v38 }
  0x2d   :  { %138 = vmatpush.msra.mxu0 %v111_v20 }
  0x2e   :  { %179 = vmatpush.msra.mxu1 %v152_v25  ;;  %215 = vmatpush.msra.mxu2 %v198_v39 }
  0x2f   :  { %139 = vmatpush.msra.mxu0 %v110_v22  ;;  %v284_v22 = vlaneseq }
  0x30   :  { %180 = vmatpush.msra.mxu1 %v151_v27  ;;  %216 = vmatpush.msra.mxu2 %v197_v40 }
  0x31   :  { %140 = vmatpush.msra.mxu0 %v109_v24 }
  0x32   :  { %181 = vmatpush.msra.mxu1 %v150_v30  ;;  %217 = vmatpush.msra.mxu2 %v196_v41 }
  0x33   :  { %141 = vmatpush.msra.mxu0 %v108_v26 }
  0x34   :  { %182 = vmatpush.msra.mxu1 %v149_v31  ;;  %218 = vmatpush.msra.mxu2 %v195_v42 }
  0x35   :  { %142 = vmatpush.msra.mxu0 %v107_v28 }
  0x36   :  { %143 = vmatmul.f32.vlgmr.msra.gmra.mxu0 %v106_v29  ;;  %183 = vmatpush.msra.mxu1 %v148_v32  ;;  %v285_v29 = vand.u32 127, %v284_v22 }
  0x37   :  { %219 = vmatpush.msra.mxu2 %v194_v43 }
  0x39   :  { %220 = vmatpush.msra.mxu2 %v193_v44 }
  0x3b   :  { %221 = vmatpush.msra.mxu2 %v192_v45 }
  0x3d   :  { %222 = vmatpush.msra.mxu2 %v191_v50 }
  0x3f   :  { %223 = vmatpush.msra.mxu2 %v190_v51 }
  0x41   :  { %224 = vmatpush.msra.mxu2 %v189_v52 }
  0xb3   :  { %v144_v47 = vpop.f32.mrf.mxu0 }
  0xb4   :  { %v145_v48 = vadd.f32 %v322_v46, %v144_v47 }
  0xb6   :  { %v147_v49 = vmax.f32 %v145_v48, 0.0 }
  0xb8   :  { %184 = vmatmul.f32.vlgmr.msra.gmra.mxu1 %v147_v49 }
 0x135   :  { %v185_v54 = vpop.f32.mrf.mxu1 }
 0x136   :  { %v186_v55 = vadd.f32 %v323_v53, %v185_v54 }
 0x138   :  { %v188_v56 = vmax.f32 %v186_v55, 0.0 }
 0x13a   :  { %225 = vmatmul.f32.vlgmr.msra.gmra.mxu2 %v188_v56 }
 0x1bd   :  { %v226_v58 = vpop.f32.mrf.mxu2 }
 0x1be   :  { %v227_v59 = vadd.f32 %v324_v57, %v226_v58 }
 0x1c0   :  { %325 = vtanh.f32 %v227_v59 }
 0x1c6   :  { %v326_v60 = vpop.eup %325 }
 0x1c7   :  { %v234_v62 = vperm.slane %v326_v60, 0  ;;  %v233_v0 = vrot.slane %v326_v60, 1 }
 0x1c9   :  { %v238_v63 = vmul.f32 %v234_v62, %v230_v61  ;;  %v235_v1 = vperm.slane %v233_v0, 0 }
 0x1cb   :  { %240 = vadd.xlane.f32.xlu0 %v238_v63  ;;  %v239_v3 = vmul.f32 %v235_v1, %v231_v2 }
 0x1d3   :  { %242 = vadd.xlane.f32.xlu0 %v239_v3 }
 0x23e   :  { %v241_v4 = vpop.xlane.xlu0 %240 }
 0x23f   :  { %v312_v5 = vmul.f32 -1.442695, %v241_v4 }
 0x241   :  { %327 = vpow2.f32 %v312_v5 }
 0x246   :  { %v243_v6 = vpop.xlane.xlu0 %242 }
 0x247   :  { %v328_v7 = vpop.eup %327  ;;  %v313_v8 = vmul.f32 -1.442695, %v243_v6 }
 0x248   :  { %v250_v9 = vadd.f32 1.0, %v328_v7 }
 0x249   :  { %329 = vpow2.f32 %v313_v8 }
 0x24a   :  { %331 = vrcp.f32 %v250_v9  ;;  %v263_v19 = vand.u32 2147483648, %v250_v9  ;;  %vm257_vm1 = vweird.f32 %v250_v9  ;;  %v261_v21 = vand.u32 2147483647, %v250_v9 }
 0x24c   :  { %v264_v27 = vor.u32 1.1754944e-38, %v263_v19  ;;  %vm262_vm5 = vcmp.eq.f32.partialorder %v261_v21, 8.507059e+37 }
 0x24f   :  { %v330_v10 = vpop.eup %329 }
 0x250   :  { %v332_v11 = vpop.eup %331  ;;  %v251_v12 = vadd.f32 1.0, %v330_v10 }
 0x251   :  { %v253_v13 = vmul.f32 %v332_v11, %v250_v9  ;;  %vm258_vm0 = vweird.f32 %v332_v11 }
 0x252   :  { %333 = vrcp.f32 %v251_v12  ;;  %v278_v23 = vand.u32 2147483648, %v251_v12  ;;  %vm259_vm2 = vmor %vm257_vm1, %vm258_vm0  ;;  %v276_v26 = vand.u32 2147483647, %v251_v12  ;;  %vm272_vm4 = vweird.f32 %v251_v12 }
 0x253   :  { %v254_v14 = vsub.f32 1.0, %v253_v13 }
 0x254   :  { %v279_v30 = vor.u32 1.1754944e-38, %v278_v23  ;;  %vm277_vm7 = vcmp.eq.f32.partialorder %v276_v26, 8.507059e+37 }
 0x255   :  { %v255_v15 = vmul.f32 %v332_v11, %v254_v14 }
 0x257   :  { %v256_v18 = vadd.f32 %v332_v11, %v255_v15 }
 0x258   :  { %v334_v16 = vpop.eup %333 }
 0x259   :  { %v268_v17 = vmul.f32 %v334_v16, %v251_v12  ;;  %vm273_vm3 = vweird.f32 %v334_v16  ;;  %v260_v25 = vsel %vm259_vm2, %v332_v11, %v256_v18 }
 0x25a   :  { %vm274_vm6 = vmor %vm272_vm4, %vm273_vm3  ;;  %v265_v31 = vsel %vm262_vm5, %v264_v27, %v260_v25 }
 0x25b   :  { %v269_v20 = vsub.f32 1.0, %v268_v17  ;;  %v286_v34 = vperm.slane %v265_v31, %v285_v29 }
 0x25d   :  { %v270_v24 = vmul.f32 %v334_v16, %v269_v20 }
 0x25f   :  { %v271_v28 = vadd.f32 %v334_v16, %v270_v24 }
 0x261   :  { %v275_v32 = vsel %vm274_vm6, %v334_v16, %v271_v28 }
 0x262   :  { %v280_v33 = vsel %vm277_vm7, %v279_v30, %v275_v32 }
 0x263   :  { %v287_v35 = vperm.slane %v280_v33, %v285_v29 }
 0x265   :  { %v289_v36 = vsel %vm288_vm8, %v287_v35, %v286_v34 }
 0x266   :  { %292 = vst.msk [vmem:[#allocation11] sm:$0x3] %vm291_vm9, %v289_v36 }
 0x267   :  { %303 = dma.vmem_to_hbm [thread:$0]  %s299_s7, 32, %s301_s12, [#allocation4]  }
 0x268   :  { %485 = dma.done.wait [#allocation4], 32  }
 0x269   :  { %486 = vsyncadd [#allocation4], 4294967264 }
 0x26a   :  { %308 = vsyncpa [#allocation3], 1 }
 0x26b   :  { %309 = vsyncpa [#allocation6], 1 }
 0x26c   :  { %310 = vsyncpa [#allocation9], 1 }
 0x26d   :  { %311 = vsyncpa [#allocation4], 1 }

</bundles_post_ra>
